<compile_context>
chip_gen: v7x
topology: tpu7x:2x2x1
jax: 0.10.0
libtpu: 0.0.40
codegen_flags: <defaults>
</compile_context>

<pallas_src>
import functools
import math

import jax
import jax.numpy as jnp
from jax.experimental import pallas as pl
from jax.experimental.pallas import tpu as pltpu


def _round_up(x, m):
    return ((x + m - 1) // m) * m


def _policy_kernel(*refs, geer, sample, act_dim, batch, tile_b, need_mask,
                   log_sigma_min, log_sigma_max):
    if sample:
        (obs_ref, noise_ref, w1_ref, b1_ref, w2_ref, b2_ref, whead_ref,
         act_ref, ll_ref) = refs
    else:
        (obs_ref, w1_ref, b1_ref, w2_ref, b2_ref, whead_ref,
         act_ref, ll_ref) = refs

    x = obs_ref[...]                                              # (D0, TB)

    # logits_net = Linear + Tanh, Linear + Identity   (mlp over sizes[:-1])
    h1 = jnp.tanh(
        jnp.dot(w1_ref[...], x, preferred_element_type=jnp.float32)
        + b1_ref[...])                                            # (H1, TB)
    logits = (jnp.dot(w2_ref[...], h1, preferred_element_type=jnp.float32)
              + b2_ref[...])                                      # (H2, TB)

    # Fused heads: one matmul produces [mu_pre ; log_sigma_pre]  (2A, TB);
    # the split is a cheap sublane slice in this layout.
    heads = jnp.dot(whead_ref[...], logits,
                    preferred_element_type=jnp.float32)           # (2A, TB)
    mu = jnp.tanh(heads[:act_dim, :]) * geer                      # (A, TB)
    log_sig = jnp.clip(heads[act_dim:, :], log_sigma_min, log_sigma_max)
    sigma = jnp.tanh(jnp.exp(log_sig))                            # (A, TB)
    log_sigma_val = jnp.log(sigma)

    half_log_2pi = 0.5 * math.log(2.0 * math.pi)
    if sample:
        # action = mu + sigma * eps  =>  z = (action - mu)/sigma == eps.
        eps = noise_ref[...]                                      # (A, TB)
        action = mu + sigma * eps
        ll = -0.5 * eps * eps - log_sigma_val - half_log_2pi
    else:
        # action = mu.detach()  =>  z == 0.
        action = mu
        ll = -log_sigma_val - half_log_2pi

    # ll[ll < -1e5] = -1e5   (per-element, before the sum)
    ll = jnp.maximum(ll, -100000.0)

    if need_mask:
        # Zero out padded batch columns (batch size is a trace-time constant).
        col = (jax.lax.broadcasted_iota(jnp.int32, ll.shape, 1)
               + pl.program_id(0) * tile_b)
        ll = jnp.where(col < batch, ll, 0.0)

    act_ref[...] = action
    # One partial sum per grid block (broadcast across the 128-lane row so the
    # output stays a plain, layout-friendly (1, 128) store).
    ll_ref[...] = jnp.full((1, 128), jnp.sum(ll), dtype=jnp.float32)


@functools.partial(jax.jit, static_argnames=("geer", "sample", "tile_b"))
def diagonal_gaussian_policy_forward(obs, params, noise=None, *, geer=1.0,
                                     sample=True, tile_b=16384):
    """Forward pass. params = (w1t, b1, w2t, b2, whead_t) in PyTorch (out,in)
    weight layout; returns (action (B,A), ll_sum scalar)."""
    w1t, b1, w2t, b2, whead_t = params
    B, D0 = obs.shape
    H1 = w1t.shape[0]
    H2 = w2t.shape[0]
    A = whead_t.shape[0] // 2

    # --- batch tile: batch lives on the lane axis => multiple of 128.
    # Default cap 16384 rows (~1 MiB/step of streamed I/O); up to ~32768 is
    # still fine on v7x's 64 MiB VMEM, larger on v5e/v6e.
    tb = min(int(tile_b), _round_up(B, 128))
    tb = max(128, _round_up(tb, 128))
    nb = pl.cdiv(B, tb)
    if nb > 1 and nb % 2 == 1:
        # Prefer an even block count so both v7x TensorCores stay busy.
        tb_alt = max(128, _round_up(pl.cdiv(B, nb + 1), 128))
        if tb_alt < tb:
            tb = tb_alt
            nb = pl.cdiv(B, tb)
    b_pad = nb * tb
    need_mask = (b_pad != B)

    # Batch-in-lanes layout: (features, batch).  Under jit the transpose and
    # the (tail-only) pad fuse into a single copy of each stream.
    obs_t = jnp.transpose(obs)
    if need_mask:
        obs_t = jnp.pad(obs_t, ((0, 0), (0, b_pad - B)))

    batch_spec = lambda i: (0, i)   # stream over batch tiles (lane axis)
    const_spec = lambda i: (0, 0)   # weights stay resident

    operands = [obs_t]
    in_specs = [pl.BlockSpec((D0, tb), batch_spec)]
    if sample:
        if noise is None:
            raise ValueError("sample=True requires standard-normal noise of "
                             "shape (B, A)")
        noise_t = jnp.transpose(noise)
        if need_mask:
            noise_t = jnp.pad(noise_t, ((0, 0), (0, b_pad - B)))
        operands.append(noise_t)
        in_specs.append(pl.BlockSpec((A, tb), batch_spec))
    # (sample=False: noise is neither passed nor DMA'd.)

    operands += [w1t, b1, w2t, b2, whead_t]
    in_specs += [
        pl.BlockSpec((H1, D0), const_spec),      # w1^T  (out, in)
        pl.BlockSpec((H1, 1), const_spec),       # b1 as column
        pl.BlockSpec((H2, H1), const_spec),      # w2^T
        pl.BlockSpec((H2, 1), const_spec),       # b2
        pl.BlockSpec((2 * A, H2), const_spec),   # [wmu ; wsig]
    ]

    kernel = functools.partial(
        _policy_kernel, geer=float(geer), sample=bool(sample), act_dim=int(A),
        batch=int(B), tile_b=int(tb), need_mask=need_mask,
        log_sigma_min=-20.0, log_sigma_max=-2.0)

    action_t, ll_blocks = pl.pallas_call(
        kernel,
        out_shape=(jax.ShapeDtypeStruct((A, b_pad), jnp.float32),
                   jax.ShapeDtypeStruct((nb, 128), jnp.float32)),
        grid=(nb,),
        in_specs=in_specs,
        out_specs=(pl.BlockSpec((A, tb), batch_spec),    # action (transposed)
                   pl.BlockSpec((1, 128), lambda i: (i, 0))),  # per-block ll
        compiler_params=pltpu.CompilerParams(
            dimension_semantics=("parallel",),
            vmem_limit_bytes=48 * 1024 * 1024),
    )(*operands)

    action = jnp.transpose(action_t[:, :B])          # (B, A)
    ll_sum = jnp.sum(ll_blocks[:, 0])                # padded cols masked in-kernel
    return action, ll_sum


def init_params(key, sizes):
    """Deterministic re-implementation of DiagonalGaussianMlpPolicy.init_parameters:
    every param ~ Uniform(-1/sqrt(param.size(-1)), +1/sqrt(param.size(-1))).
    Weights are kept in PyTorch (out, in) layout; biases stored as (out, 1);
    the two bias-free head weights are fused once here into (2A, H2)."""
    d0, h1, h2, a = sizes
    keys = jax.random.split(key, 6)

    def uni(k, shape, fan):
        stdv = 1.0 / math.sqrt(fan)
        return jax.random.uniform(k, shape, jnp.float32, -stdv, stdv)

    w1t = uni(keys[0], (h1, d0), d0)     # Linear(d0, h1) weight (out, in)
    b1 = uni(keys[1], (h1, 1), h1)       # bias, size(-1) = out
    w2t = uni(keys[2], (h2, h1), h1)
    b2 = uni(keys[3], (h2, 1), h2)
    wmu_t = uni(keys[4], (a, h2), h2)    # mu_net (bias=False)
    wsig_t = uni(keys[5], (a, h2), h2)   # log_sigma_net (bias=False)
    whead_t = jnp.concatenate([wmu_t, wsig_t], axis=0)   # fused once
    return (w1t, b1, w2t, b2, whead_t)


def reference_forward(obs, params, noise, *, geer=1.0, sample=True):
    """Pure-JAX reference mirroring the PyTorch module."""
    w1t, b1, w2t, b2, whead_t = params
    a = whead_t.shape[0] // 2
    h1 = jnp.tanh(obs @ w1t.T + b1[:, 0])
    logits = h1 @ w2t.T + b2[:, 0]
    heads = logits @ whead_t.T
    mu = jnp.tanh(heads[:, :a]) * geer
    sigma = jnp.tanh(jnp.exp(jnp.clip(heads[:, a:], -20.0, -2.0)))
    action = mu + sigma * noise if sample else mu
    z = (action - mu) / sigma
    ll = -0.5 * z * z - jnp.log(sigma) - 0.5 * math.log(2.0 * math.pi)
    ll = jnp.maximum(ll, -100000.0)
    return action, jnp.sum(ll)


if __name__ == "__main__":
    # sizes = [obs_dim, hidden1, hidden2, act_dim]
    sizes = [8, 32, 32, 4]
    batch = 2

    root = jax.random.PRNGKey(0)
    k_param, k_obs, k_noise, k_obs2, k_noise2 = jax.random.split(root, 5)

    params = init_params(k_param, sizes)
    obs = jax.random.normal(k_obs, (batch, sizes[0]), jnp.float32)
    noise = jax.random.normal(k_noise, (batch, sizes[-1]), jnp.float32)

    # sample=True path (stochastic action via provided standard-normal noise)
    action, ll_sum = diagonal_gaussian_policy_forward(
        obs, params, noise, geer=1.0, sample=True)
    jax.block_until_ready((action, ll_sum))
    ref_a, ref_ll = reference_forward(obs, params, noise, geer=1.0, sample=True)
    assert action.shape == (batch, sizes[-1])
    assert ll_sum.shape == ()
    assert bool(jnp.all(jnp.isfinite(action)))
    assert bool(jnp.allclose(action, ref_a, atol=2e-2, rtol=2e-2))
    assert abs(float(ll_sum) - float(ref_ll)) <= 0.1 + 1e-2 * abs(float(ref_ll))

    # sample=False path (action = mu; noise is neither passed nor DMA'd)
    action_det, ll_det = diagonal_gaussian_policy_forward(
        obs, params, None, geer=1.0, sample=False)
    jax.block_until_ready((action_det, ll_det))
    ref_ad, ref_lld = reference_forward(obs, params, noise, geer=1.0,
                                        sample=False)
    assert action_det.shape == (batch, sizes[-1])
    assert bool(jnp.allclose(action_det, ref_ad, atol=2e-2, rtol=2e-2))
    assert abs(float(ll_det) - float(ref_lld)) <= 0.1 + 1e-2 * abs(float(ref_lld))

    # Multi-block path: batch not a multiple of the tile -> in-kernel masking
    # of padded columns across several "parallel" grid blocks.
    batch2 = 300
    obs2 = jax.random.normal(k_obs2, (batch2, sizes[0]), jnp.float32)
    noise2 = jax.random.normal(k_noise2, (batch2, sizes[-1]), jnp.float32)
    action2, ll2 = diagonal_gaussian_policy_forward(
        obs2, params, noise2, geer=1.0, sample=True, tile_b=128)
    jax.block_until_ready((action2, ll2))
    ref_a2, ref_ll2 = reference_forward(obs2, params, noise2, geer=1.0,
                                        sample=True)
    assert action2.shape == (batch2, sizes[-1])
    assert bool(jnp.allclose(action2, ref_a2, atol=2e-2, rtol=2e-2))
    assert abs(float(ll2) - float(ref_ll2)) <= 0.1 + 1e-2 * abs(float(ref_ll2))

    # TODO(synk): fixed_action branch (torch.tensor(fixed_action)) is host-side
    # glue in the original module; handled outside the kernel if ever needed.

    print("KERNEL_OK")
</pallas_src>

<mosaic_0001>
module attributes {stable_mosaic.version = 11 : i64} {
  func.func @_policy_kernel(%arg0: i32, %arg1: memref<8x128xf32, #tpu.memory_space<vmem>>, %arg2: memref<4x128xf32, #tpu.memory_space<vmem>>, %arg3: memref<32x8xf32, #tpu.memory_space<vmem>>, %arg4: memref<32x1xf32, #tpu.memory_space<vmem>>, %arg5: memref<32x32xf32, #tpu.memory_space<vmem>>, %arg6: memref<32x1xf32, #tpu.memory_space<vmem>>, %arg7: memref<8x32xf32, #tpu.memory_space<vmem>>, %arg8: memref<4x128xf32, #tpu.memory_space<vmem>>, %arg9: memref<1x128xf32, #tpu.memory_space<vmem>>) attributes {dimension_semantics = [#tpu.dimension_semantics<parallel>], iteration_bounds = array<i64: 1>, scalar_prefetch = 0 : i64, scratch_operands = 0 : i64, tpu.core_type = #tpu.core_type<tc>, window_params = [{transform_indices = @transform_0, window_bounds = array<i64: 8, 128>}, {transform_indices = @transform_1, window_bounds = array<i64: 4, 128>}, {pipeline_mode = #tpu.pipeline_mode<synchronous>, transform_indices = @transform_2, window_bounds = array<i64: 32, 8>}, {pipeline_mode = #tpu.pipeline_mode<synchronous>, transform_indices = @transform_3, window_bounds = array<i64: 32, 1>}, {pipeline_mode = #tpu.pipeline_mode<synchronous>, transform_indices = @transform_4, window_bounds = array<i64: 32, 32>}, {pipeline_mode = #tpu.pipeline_mode<synchronous>, transform_indices = @transform_5, window_bounds = array<i64: 32, 1>}, {pipeline_mode = #tpu.pipeline_mode<synchronous>, transform_indices = @transform_6, window_bounds = array<i64: 8, 32>}, {transform_indices = @transform_7, window_bounds = array<i64: 4, 128>}, {transform_indices = @transform_8, window_bounds = array<i64: 1, 128>}]} {
    %c0 = arith.constant 0 : index
    %c0_0 = arith.constant 0 : index
    %0 = vector.load %arg1[%c0, %c0_0] : memref<8x128xf32, #tpu.memory_space<vmem>>, vector<8x128xf32>
    %c0_1 = arith.constant 0 : index
    %c0_2 = arith.constant 0 : index
    %1 = vector.load %arg3[%c0_1, %c0_2] : memref<32x8xf32, #tpu.memory_space<vmem>>, vector<32x8xf32>
    %cst = arith.constant dense<0.000000e+00> : vector<32x128xf32>
    %2 = tpu.matmul %1, %0, %cst {dimension_numbers = #tpu.dot_dimension_numbers<[1], [0], [0], [1], [0, 0, 1, 1], [], []>} : vector<32x8xf32>, vector<8x128xf32>, vector<32x128xf32> -> vector<32x128xf32>
    %c0_3 = arith.constant 0 : index
    %c0_4 = arith.constant 0 : index
    %3 = vector.load %arg4[%c0_3, %c0_4] : memref<32x1xf32, #tpu.memory_space<vmem>>, vector<32x1xf32>
    %4 = vector.broadcast %3 : vector<32x1xf32> to vector<32x128xf32>
    %5 = arith.addf %2, %4 : vector<32x128xf32>
    %6 = math.tanh %5 : vector<32x128xf32>
    %c0_5 = arith.constant 0 : index
    %c0_6 = arith.constant 0 : index
    %7 = vector.load %arg5[%c0_5, %c0_6] : memref<32x32xf32, #tpu.memory_space<vmem>>, vector<32x32xf32>
    %cst_7 = arith.constant dense<0.000000e+00> : vector<32x128xf32>
    %8 = tpu.matmul %7, %6, %cst_7 {dimension_numbers = #tpu.dot_dimension_numbers<[1], [0], [0], [1], [0, 0, 1, 1], [], []>} : vector<32x32xf32>, vector<32x128xf32>, vector<32x128xf32> -> vector<32x128xf32>
    %c0_8 = arith.constant 0 : index
    %c0_9 = arith.constant 0 : index
    %9 = vector.load %arg6[%c0_8, %c0_9] : memref<32x1xf32, #tpu.memory_space<vmem>>, vector<32x1xf32>
    %10 = vector.broadcast %9 : vector<32x1xf32> to vector<32x128xf32>
    %11 = arith.addf %8, %10 : vector<32x128xf32>
    %c0_10 = arith.constant 0 : index
    %c0_11 = arith.constant 0 : index
    %12 = vector.load %arg7[%c0_10, %c0_11] : memref<8x32xf32, #tpu.memory_space<vmem>>, vector<8x32xf32>
    %cst_12 = arith.constant dense<0.000000e+00> : vector<8x128xf32>
    %13 = tpu.matmul %12, %11, %cst_12 {dimension_numbers = #tpu.dot_dimension_numbers<[1], [0], [0], [1], [0, 0, 1, 1], [], []>} : vector<8x32xf32>, vector<32x128xf32>, vector<8x128xf32> -> vector<8x128xf32>
    %14 = vector.extract_strided_slice %13 {offsets = [0, 0], sizes = [4, 128], strides = [1, 1]} : vector<8x128xf32> to vector<4x128xf32>
    %15 = math.tanh %14 : vector<4x128xf32>
    %cst_13 = arith.constant 1.000000e+00 : f32
    %16 = vector.broadcast %cst_13 : f32 to vector<4x128xf32>
    %17 = arith.mulf %15, %16 : vector<4x128xf32>
    %18 = vector.extract_strided_slice %13 {offsets = [4, 0], sizes = [4, 128], strides = [1, 1]} : vector<8x128xf32> to vector<4x128xf32>
    %cst_14 = arith.constant -2.000000e+01 : f32
    %cst_15 = arith.constant -2.000000e+00 : f32
    %19 = vector.broadcast %cst_14 : f32 to vector<4x128xf32>
    %20 = arith.maximumf %19, %18 : vector<4x128xf32>
    %21 = vector.broadcast %cst_15 : f32 to vector<4x128xf32>
    %22 = arith.minimumf %21, %20 : vector<4x128xf32>
    %23 = math.exp %22 : vector<4x128xf32>
    %24 = math.tanh %23 : vector<4x128xf32>
    %25 = math.log %24 : vector<4x128xf32>
    %c0_16 = arith.constant 0 : index
    %c0_17 = arith.constant 0 : index
    %26 = vector.load %arg2[%c0_16, %c0_17] : memref<4x128xf32, #tpu.memory_space<vmem>>, vector<4x128xf32>
    %27 = arith.mulf %24, %26 : vector<4x128xf32>
    %28 = arith.addf %17, %27 : vector<4x128xf32>
    %cst_18 = arith.constant -5.000000e-01 : f32
    %29 = vector.broadcast %cst_18 : f32 to vector<4x128xf32>
    %30 = arith.mulf %29, %26 : vector<4x128xf32>
    %31 = arith.mulf %30, %26 : vector<4x128xf32>
    %32 = arith.subf %31, %25 : vector<4x128xf32>
    %cst_19 = arith.constant 0.918938517 : f32
    %33 = vector.broadcast %cst_19 : f32 to vector<4x128xf32>
    %34 = arith.subf %32, %33 : vector<4x128xf32>
    %cst_20 = arith.constant -1.000000e+05 : f32
    %35 = vector.broadcast %cst_20 : f32 to vector<4x128xf32>
    %36 = arith.maximumf %34, %35 : vector<4x128xf32>
    %37 = tpu.iota {dimensions = array<i32: 1>} : vector<4x128xi32>
    %c128_i32 = arith.constant 128 : i32
    %38 = arith.muli %arg0, %c128_i32 : i32
    %39 = vector.broadcast %38 : i32 to vector<4x128xi32>
    %40 = arith.addi %37, %39 : vector<4x128xi32>
    %c2_i32 = arith.constant 2 : i32
    %41 = vector.broadcast %c2_i32 : i32 to vector<4x128xi32>
    %42 = arith.cmpi slt, %40, %41 : vector<4x128xi32>
    %cst_21 = arith.constant 0.000000e+00 : f32
    %43 = vector.broadcast %cst_21 : f32 to vector<4x128xf32>
    %44 = arith.select %42, %36, %43 : vector<4x128xi1>, vector<4x128xf32>
    %c0_22 = arith.constant 0 : index
    %c0_23 = arith.constant 0 : index
    %45 = vector.load %arg8[%c0_22, %c0_23] : memref<4x128xf32, #tpu.memory_space<vmem>>, vector<4x128xf32>
    tpu.vector_store %arg8[%c0_22, %c0_23], %28 {strides = array<i32>} : memref<4x128xf32, #tpu.memory_space<vmem>>, vector<4x128xf32>,
    %46 = vector.shape_cast %44 : vector<4x128xf32> to vector<1x4x128xf32>
    %cst_24 = arith.constant dense<0.000000e+00> : vector<1xf32>
    %47 = vector.multi_reduction <add>, %46, %cst_24 [1, 2] : vector<1x4x128xf32> to vector<1xf32>
    %48 = vector.shape_cast %47 : vector<1xf32> to vector<1x1x1xf32>
    %49 = vector.extract %48[0, 0, 0] : f32 from vector<1x1x1xf32>
    %50 = vector.broadcast %49 : f32 to vector<1x128xf32>
    %c0_25 = arith.constant 0 : index
    %c0_26 = arith.constant 0 : index
    %51 = vector.load %arg9[%c0_25, %c0_26] : memref<1x128xf32, #tpu.memory_space<vmem>>, vector<1x128xf32>
    tpu.vector_store %arg9[%c0_25, %c0_26], %50 {strides = array<i32>} : memref<1x128xf32, #tpu.memory_space<vmem>>, vector<1x128xf32>,
    return
  }
  func.func @transform_0(%arg0: i32) -> (i32, i32) {
    %c0_i32 = arith.constant 0 : i32
    %c0_i32_0 = arith.constant 0 : i32
    return %c0_i32, %arg0 : i32, i32
  }
  func.func @transform_1(%arg0: i32) -> (i32, i32) {
    %c0_i32 = arith.constant 0 : i32
    %c0_i32_0 = arith.constant 0 : i32
    return %c0_i32, %arg0 : i32, i32
  }
  func.func @transform_2(%arg0: i32) -> (i32, i32) {
    %c0_i32 = arith.constant 0 : i32
    %c0_i32_0 = arith.constant 0 : i32
    %c0_i32_1 = arith.constant 0 : i32
    return %c0_i32, %c0_i32_0 : i32, i32
  }
  func.func @transform_3(%arg0: i32) -> (i32, i32) {
    %c0_i32 = arith.constant 0 : i32
    %c0_i32_0 = arith.constant 0 : i32
    %c0_i32_1 = arith.constant 0 : i32
    return %c0_i32, %c0_i32_0 : i32, i32
  }
  func.func @transform_4(%arg0: i32) -> (i32, i32) {
    %c0_i32 = arith.constant 0 : i32
    %c0_i32_0 = arith.constant 0 : i32
    %c0_i32_1 = arith.constant 0 : i32
    return %c0_i32, %c0_i32_0 : i32, i32
  }
  func.func @transform_5(%arg0: i32) -> (i32, i32) {
    %c0_i32 = arith.constant 0 : i32
    %c0_i32_0 = arith.constant 0 : i32
    %c0_i32_1 = arith.constant 0 : i32
    return %c0_i32, %c0_i32_0 : i32, i32
  }
  func.func @transform_6(%arg0: i32) -> (i32, i32) {
    %c0_i32 = arith.constant 0 : i32
    %c0_i32_0 = arith.constant 0 : i32
    %c0_i32_1 = arith.constant 0 : i32
    return %c0_i32, %c0_i32_0 : i32, i32
  }
  func.func @transform_7(%arg0: i32) -> (i32, i32) {
    %c0_i32 = arith.constant 0 : i32
    %c0_i32_0 = arith.constant 0 : i32
    return %c0_i32, %arg0 : i32, i32
  }
  func.func @transform_8(%arg0: i32) -> (i32, i32) {
    %c0_i32 = arith.constant 0 : i32
    %c0_i32_0 = arith.constant 0 : i32
    return %arg0, %c0_i32 : i32, i32
  }
}

</mosaic_0001>

<bundles_post_ra>
// kernel: diagonal_gaussian_policy_forward.1
= control target key start
LH: loop header
LB: loop body
LE: loop exit
PB: predicated region body
PF: predicated region fallthrough
CT: control target
= control target key end

     0   :  { %vm58_vm0 = vcmask 64512   ;;  %v548_v5 = vmov 0   ;;  %s679_s0 = inlined_call_operand.vmem [shape: f32[8,128], index: 0, kind: input, shape index: {}]   ;;  %s680_s1 = inlined_call_operand.vmem [shape: f32[4,128], index: 1, kind: input, shape index: {}]   ;;  %s681_s2 = inlined_call_operand.vmem [shape: f32[32,8], index: 2, kind: input, shape index: {}]   ;;  %s682_s3 = inlined_call_operand.vmem [shape: f32[32,1], index: 3, kind: input, shape index: {}]   ;;  %s683_s4 = inlined_call_operand.vmem [shape: f32[32,32], index: 4, kind: input, shape index: {}]   ;;  %s684_s5 = inlined_call_operand.vmem [shape: f32[32,1], index: 5, kind: input, shape index: {}]   ;;  %s685_s6 = inlined_call_operand.vmem [shape: f32[8,32], index: 6, kind: input, shape index: {}]   ;;  %s686_s7 = inlined_call_operand.vmem [shape: f32[4,128], index: 7, kind: output, shape index: {0}]   ;;  %s687_s8 = inlined_call_operand.hbm [shape: f32[1,128], index: 8, kind: output, shape index: {1}]  }
   0x1   :  { %v29_v0 = vld [vmem:[%s679_s0] sm:$0xff]  ;;  %v31_v2 = vld [vmem:[%s681_s2 + $0x8] sm:$0xff]  ;;  %v32_v3 = vld [vmem:[%s681_s2 + $0x10] sm:$0xff]  ;;  %506 = vset.pattern.permute.xlu0 %v548_v5  ;;  %507 = vset.pattern.permute.xlu1 %v548_v5 }
   0x2   :  { %v30_v1 = vld [vmem:[%s681_s2] sm:$0xff]  ;;  %452 = vmatprep.subr.mxu0 %v29_v0  ;;  %v36_v6 = vld [vmem:[%s682_s3 + $0x10] sm:$0xff]  ;;  %v33_v7 = vld [vmem:[%s681_s2 + $0x18] sm:$0xff] }
   0x3   :  { %454 = vmatprep.mubr.msk.f32.mxu0 %vm58_vm0, %v30_v1  ;;  %v34_v4 = vld [vmem:[%s682_s3] sm:$0xff]  ;;  %453 = vmatpush3.msra.mxu0 %v29_v0  ;;  %v35_v8 = vld [vmem:[%s682_s3 + $0x8] sm:$0xff] }
   0x4   :  { %455 = vmatmul.mubr.msk.f32.vlgmr.msra.gmra.mrb[0].mxu0 %vm58_vm0, %v31_v2  ;;  %40 = vperm.xlu0 %506, %v34_v4  }
   0x5   :  { %457 = vmatprep.mubr.msk.f32.mxu0 %vm58_vm0, %v32_v3 }
   0x6   :  { %14 = vsyncpa [#allocation3], 0  ;;  %50 = vperm.xlu1 %507, %v36_v6   ;;  %v37_v9 = vld [vmem:[%s682_s3 + $0x18] sm:$0xff]  ;;  %v164_v10 = vld [vmem:[%s684_s5] sm:$0xff]  ;;  %vm188_vm1 = vcmask 261120   ;;  %v549_v36 = vmov 0.0|0.0   ;;  %v385_v4 = vlaneseq }
   0x7   :  { %v165_v11 = vld [vmem:[%s684_s5 + $0x8] sm:$0xff]  ;;  %v166_v12 = vld [vmem:[%s684_s5 + $0x10] sm:$0xff]  ;;  %v167_v13 = vld [vmem:[%s684_s5 + $0x18] sm:$0xff]  ;;  %493 = vmatprep.subr.bf16.mxu0 %v549_v36  ;;  %vm550_vm2 = vmmov 0   ;;  %v551_v37 = vmov 0.0   ;;  %vm393_vm4 = vcmask 1043456  }
   0x8   :  { %458 = vmatmul.mubr.msk.f32.gmra.mrb[2].mxu0 %vm58_vm0, %v33_v7  ;;  %45 = vperm.xlu0 %506, %v35_v8   ;;  %v160_v14 = vld [vmem:[%s683_s4] sm:$0xff]  ;;  %v161_v33 = vld [vmem:[%s683_s4 + $0x8] sm:$0xff]  ;;  %v162_v34 = vld [vmem:[%s683_s4 + $0x10] sm:$0xff]  ;;  %v386_v8 = vand.u32 127, %v385_v4 }
   0x9   :  { %468 = vmatprep.mubr.msk.f32.mxu1 %vm188_vm1, %v160_v14  ;;  %v163_v35 = vld [vmem:[%s683_s4 + $0x18] sm:$0xff]  ;;  %482 = vmatprep.mubr.msk.f32.mxu0 %vm550_vm2, %v551_v37  ;;  %v286_v52 = vld [vmem:[%s685_s6] sm:$0xff] }
   0xa   :  { %55 = vperm.xlu1 %507, %v37_v9   ;;  %v368_v59 = vld [vmem:[%s680_s1] sm:$0xf]  ;;  %vm390_vm3 = vcmp.lt.s32.totalorder %v386_v8, 2  ;;  %s552_s1 = smov [#allocation2]  }
   0xb   :  { %v370_v60 = vrot.slane %v368_v59, 4  ;;  %v377_v2 = vmul.f32 -0.5, %v368_v59 }
   0xc   :  { %170 = vperm.xlu0 %506, %v164_v10  }
   0xd   :  { %v378_v6 = vmul.f32 %v377_v2, %v368_v59 }
   0xe   :  { %175 = vperm.xlu1 %507, %v165_v11  }
  0x10   :  { %180 = vperm.xlu0 %506, %v166_v12  }
  0x12   :  { %185 = vperm.xlu1 %507, %v167_v13  }
  0x83   :  { %v41_v15 = vpop.permute.xlu0 %40 }
  0x85   :  { %v51_v16 = vpop.permute.xlu1 %50 }
  0x87   :  { %v46_v17 = vpop.permute.xlu0 %45 }
  0x89   :  { %v56_v22 = vpop.permute.xlu1 %55 }
  0x8b   :  { %v171_v39 = vpop.permute.xlu0 %170 }
  0x8d   :  { %v176_v38 = vpop.permute.xlu1 %175 }
  0x8f   :  { %v181_v47 = vpop.permute.xlu0 %180 }
  0x91   :  { %v186_v44 = vpop.permute.xlu1 %185 }
  0xd7   :  { %v456_v18 = vpop.f32.mrb[0].mxu0 }
  0xd8   :  { %v143_v19 = vadd.f32 %v456_v18, %v46_v17  ;;  %v137_v20 = vpop.f32.mrb[1].mxu0 }
  0xd9   :  { %v138_v21 = vadd.f32 %v137_v20, %v41_v15 }
  0xda   :  { %508 = vtanh.f32 %v143_v19 }
  0xdb   :  { %510 = vtanh.f32 %v138_v21  ;;  %v459_v23 = vpop.f32.mrb[2].mxu0 }
  0xdc   :  { %v153_v24 = vadd.f32 %v459_v23, %v56_v22  ;;  %v147_v25 = vpop.f32.mrb[3].mxu0 }
  0xdd   :  { %v148_v26 = vadd.f32 %v147_v25, %v51_v16 }
  0xde   :  { %512 = vtanh.f32 %v153_v24 }
  0xdf   :  { %514 = vtanh.f32 %v148_v26 }
  0xe4   :  { %v509_v27 = vpop.eup %508 }
  0xe5   :  { %v511_v28 = vpop.eup %510 }
  0xe6   :  { %v485_v29 = vpack.c.bf16 %v509_v27, %v511_v28 }
  0xe8   :  { %v513_v30 = vpop.eup %512  ;;  %486 = vmatprep.subr.bf16.mxu1 %v485_v29 }
  0xe9   :  { %v515_v31 = vpop.eup %514  ;;  %488 = vmatpush3.bf16.msra.mxu1 %v485_v29 }
  0xea   :  { %v489_v32 = vpack.c.bf16 %v513_v30, %v515_v31 }
  0xec   :  { %490 = vmatprep.subr.bf16.mxu1 %v489_v32 }
  0xed   :  { %492 = vmatpush3.bf16.msra.mxu1 %v489_v32 }
  0xf0   :  { %469 = vmatmul.mubr.msk.f32.vlgmr.msra.gmra.mrb[0].mxu1 %vm188_vm1, %v161_v33 }
  0xf1   :  { %471 = vmatprep.mubr.msk.f32.mxu1 %vm188_vm1, %v162_v34 }
  0xf4   :  { %472 = vmatmul.mubr.msk.f32.gmra.mrb[2].mxu1 %vm188_vm1, %v163_v35 }
 0x1c3   :  { %v470_v40 = vpop.f32.mrb[0].mxu1 }
 0x1c4   :  { %v273_v41 = vadd.f32 %v470_v40, %v176_v38  ;;  %v267_v42 = vpop.f32.mrb[1].mxu1 }
 0x1c5   :  { %v268_v43 = vadd.f32 %v267_v42, %v171_v39 }
 0x1c7   :  { %v494_v45 = vpack.c.bf16 %v273_v41, %v268_v43  ;;  %v473_v46 = vpop.f32.mrb[2].mxu1 }
 0x1c8   :  { %v283_v48 = vadd.f32 %v473_v46, %v186_v44  ;;  %v277_v49 = vpop.f32.mrb[3].mxu1 }
 0x1c9   :  { %v278_v50 = vadd.f32 %v277_v49, %v181_v47  ;;  %495 = vmatpush3.bf16.msra.mxu0 %v494_v45 }
 0x1ca   :  { %496 = vmatprep.subr.bf16.mxu0 %v549_v36 }
 0x1cb   :  { %v497_v51 = vpack.c.bf16 %v283_v48, %v278_v50 }
 0x1cd   :  { %498 = vmatpush3.bf16.msra.mxu0 %v497_v51 }
 0x1d0   :  { %483 = vmatmul.mubr.msk.f32.vlgmr.msra.gmra.mrb[4].mxu0 %vm188_vm1, %v286_v52 }
 0x2a3   :  { %v356_v53 = vpop.f32.mrb[4].mxu0 }
 0x2a4   :  { %v361_v54 = vmax.f32 %v356_v53, -20.0  ;;  %v484_v55 = vpop.f32.mrb[5].mxu0 }
 0x2a6   :  { %v362_v56 = vmin.f32 %v361_v54, -2.0 }
 0x2a8   :  { %v363_v57 = vmul.f32 1.442695, %v362_v56 }
 0x2aa   :  { %516 = vpow2.f32 %v363_v57 }
 0x2b4   :  { %v517_v58 = vpop.eup %516 }
 0x2b5   :  { %518 = vtanh.f32 %v517_v58 }
 0x2b6   :  { %520 = vtanh.f32 %v356_v53 }
 0x2bf   :  { %v519_v61 = vpop.eup %518 }
 0x2c0   :  { %522 = vlog2.f32 %v519_v61  ;;  %v372_v62 = vmul.f32 %v519_v61, %v370_v60  ;;  %v521_v0 = vpop.eup %520 }
 0x2c2   :  { %v374_v63 = vrot.slane %v372_v62, 4 }
 0x2c4   :  { %v376_v1 = vadd.f32 %v521_v0, %v374_v63 }
 0x2c6   :  { %392 = vst [vmem:[%s686_s7] sm:$0xf] %v376_v1  ;;  %s414_s7 = sshll.u32 %s552_s1, 4  ;;  %s415_s7 = int_to_ptr.vmem [resolvable:$true] %s414_s7 }
 0x2c7   :  { %s524_s17 = scalar_lea.vmem %s415_s7, 16  ;;  %s528_s18 = scalar_lea.vmem %s415_s7, 32 }
 0x2c8   :  { %p525_p0 = scmp.ne.s32.totalorder %s415_s7, %s524_s17  ;;  %p529_p1 = scmp.lt.s32.totalorder %s415_s7, %s415_s7 }
 0x2c9   :  { %p530_p2 = scmp.lt.s32.totalorder %s528_s18, %s524_s17 }
 0x2ca   :  { %v523_v3 = vpop.eup %522 }
 0x2cb   :  { %v367_v5 = vmul.f32 0.6931472, %v523_v3  ;;  %p531_p3 = por %p530_p2, %p529_p1 }
 0x2cd   :  { %v380_v7 = vrot.slane %v367_v5, 4  ;;  %p532_p4 = pnand %p531_p3, %p525_p0 }
 0x2cf   :  { %v382_v9 = vsub.f32 %v378_v6, %v380_v7 }
 0x2d1   :  { %v433_v10 = vadd.f32 -0.9189385, %v382_v9 }
 0x2d3   :  { %v384_v11 = vmax.f32 %v433_v10, -100000.0 }
 0x2d5   :  { %v391_v12 = vsel %vm390_vm3, %v384_v11, 0.0 }
 0x2d6   :  { %v394_v13 = vsel %vm393_vm4, %v391_v12, 0.0 }
 0x2d7   :  { %395 = vadd.xlane.f32.xlu0 %v394_v13 }
 0x364   :  { %v396_v14 = vpop.xlane.xlu0 %395 }
 0x365   :  { %v397_v15 = vrot.slane %v396_v14, 4 }
 0x367   :  { %v398_v16 = vadd.f32 %v397_v15, %v396_v14 }
 0x369   :  { %v399_v17 = vrot.slane %v398_v16, 2 }
 0x36b   :  { %v400_v18 = vadd.f32 %v399_v17, %v398_v16 }
 0x36d   :  { %v401_v19 = vrot.slane %v400_v18, 1 }
 0x36f   :  { %v402_v20 = vadd.f32 %v401_v19, %v400_v18 }
 0x371   :  { %499 = vpush %v402_v20 }
 0x3a2   :  { %s500_s16 = spop %499 }
 0x3a3   :  { %v404_v21 = vstv %s500_s16 }
 0x3a4   :  { %405 = vst [vmem:[#allocation2] sm:$0x1] %v404_v21 }
 0x3a5   :  { %535 = shalt.err (!%p532_p4)
}
 0x3a6   :  { %s536_s21 = scalar_lea.hbm %s687_s8, 16 }
 0x3a7   :  { %p537_p5 = scmp.ne.s32.totalorder %s687_s8, %s536_s21  ;;  %p540_p6 = scmp.lt.u32.totalorder %s536_s21, %s687_s8 }
 0x3a9   :  { %p542_p7 = pnand %p540_p6, %p537_p5 }
 0x3ab   :  { %545 = shalt.err (!%p542_p7)
}
 0x3ac   :  { %417 = dma.vmem_to_hbm [thread:$0]  %s415_s7, 16, %s687_s8, [#allocation3]  }
 0x3ad   :  { %546 = dma.done.wait [#allocation3], 16  }
 0x3ae   :  { %547 = vsyncadd [#allocation3], 4294967280 }
 0x3af   :  { %423 = vsyncpa [#allocation3], 1 }

</bundles_post_ra>
